<compile_context>
chip_gen: v5e
topology: v5e:2x2
jax: 0.10.0
libtpu: 0.0.40
codegen_flags: <defaults>
</compile_context>

<pallas_src>
import functools

import jax
import jax.numpy as jnp
from jax.experimental import pallas as pl
from jax.experimental.pallas import tpu as pltpu

BN_EPS = 1e-5


def convblock_kernel(x_ref, w_ref, gamma_ref, beta_ref, o_ref, xz_ref, cols_ref,
                     *, H, W):
    # x_ref:     (N, Cin, P)           NCHW input with spatial flattened, P = H*W
    # w_ref:     (Cout, 9*Cin)         conv weight, k = (kh*3 + kw)*Cin + c
    # gamma_ref: (Cout, 1)             BN scale
    # beta_ref:  (Cout, 1)             BN shift
    # o_ref:     (N, Cout, P)          output (reshapes to NCHW for free)
    # xz_ref:    (N, Cin, P + 2*(W+1)) zero-padded flat input   (VMEM scratch)
    # cols_ref:  (N, 9*Cin, P)         im2col matrix            (VMEM scratch)
    N, Cin, P = x_ref.shape
    pad = W + 1

    # ZeroPad2d(1) in the flattened-spatial domain: W+1 zeros on each side
    # cover the top/bottom padding rows; left/right edges are handled by the
    # column masks below.
    xz_ref[...] = jnp.zeros(xz_ref.shape, xz_ref.dtype)
    xz_ref[:, :, pad:pad + P] = x_ref[...].astype(jnp.float32)

    # Edge-column masks, hoisted; only the dw = +/-1 taps need them.
    col = jax.lax.broadcasted_iota(jnp.int32, (1, 1, P), 2) % W
    mask_l = (col > 0).astype(jnp.float32)       # dw = -1 invalid at w == 0
    mask_r = (col < W - 1).astype(jnp.float32)   # dw = +1 invalid at w == W-1

    # im2col: cols[n, (kh*3+kw)*Cin + c, p] = zero-padded x[n, c, h+kh-1, w+kw-1]
    for kh in range(3):
        for kw in range(3):
            dh, dw = kh - 1, kw - 1
            start = pad + dh * W + dw
            tap = xz_ref[:, :, start:start + P]          # ref slice, (N, Cin, P)
            if dw == -1:
                tap = tap * mask_l
            elif dw == 1:
                tap = tap * mask_r
            t = kh * 3 + kw
            cols_ref[:, t * Cin:(t + 1) * Cin, :] = tap

    # Convolution as one fused MXU matmul per image: (Cout, 9*Cin) x (9*Cin, P).
    # TODO(synk): at production channel counts cast the matmul operands to bf16
    # (keep f32 accumulation) for native MXU rate; at Cin=4/Cout=8 it only
    # costs test tolerance, so f32 operands are kept here.
    w = w_ref[...].astype(jnp.float32)
    acc = [jnp.dot(w, cols_ref[n], preferred_element_type=jnp.float32)
           for n in range(N)]                            # each (Cout, P), f32

    # Single-pass BatchNorm2d (training mode): batch stats over (N, H, W),
    # biased variance, gamma/beta folded into one per-channel scale/shift.
    s1 = sum(jnp.sum(a, axis=1, keepdims=True) for a in acc)       # (Cout, 1)
    s2 = sum(jnp.sum(a * a, axis=1, keepdims=True) for a in acc)   # (Cout, 1)
    inv_cnt = 1.0 / (N * P)
    mean = s1 * inv_cnt
    var = s2 * inv_cnt - mean * mean
    scale = gamma_ref[...] * jax.lax.rsqrt(var + BN_EPS)
    shift = beta_ref[...] - mean * scale

    # Normalize + ReLU; lane-dense (Cout, P) stores.
    for n in range(N):
        o_ref[n] = jnp.maximum(acc[n] * scale + shift, 0.0).astype(o_ref.dtype)


def conv_block_forward(x_nchw, weight_oihw, gamma, beta):
    """ConvBlock forward. x_nchw: (N, C_in, H, W). Returns (N, C_out, H, W)."""
    N, Cin, H, W = x_nchw.shape
    Cout = weight_oihw.shape[0]
    P = H * W

    # Free reshape (no transpose): NCHW -> (N, Cin, H*W).
    x_flat = x_nchw.reshape(N, Cin, P)
    # Tiny (Cout*Cin*9-element) weight reorder: OIHW -> (Cout, 9*Cin), with
    # k = (kh*3 + kw)*Cin + c matching the im2col row order in the kernel.
    w2d = jnp.transpose(weight_oihw, (0, 2, 3, 1)).reshape(Cout, 9 * Cin)
    gamma2 = gamma.reshape(Cout, 1).astype(jnp.float32)
    beta2 = beta.reshape(Cout, 1).astype(jnp.float32)

    vmem = pl.BlockSpec(memory_space=pltpu.MemorySpace.VMEM)
    kernel = functools.partial(convblock_kernel, H=H, W=W)

    # TODO(synk): for production fractal_net shapes (C up to 512, larger N/H/W)
    # this whole-problem-in-VMEM call must gain a grid over N / H-row blocks
    # (marked "parallel", two-pass BN or VMEM-scratch stat accumulation) to fit
    # v7x's 64 MiB VMEM; at 2x4x16x16 (~100 KiB total) gridless is fastest.
    out_flat = pl.pallas_call(
        kernel,
        out_shape=jax.ShapeDtypeStruct((N, Cout, P), x_nchw.dtype),
        in_specs=[vmem, vmem, vmem, vmem],
        out_specs=vmem,
        scratch_shapes=[
            pltpu.VMEM((N, Cin, P + 2 * (W + 1)), jnp.float32),  # padded flat input
            pltpu.VMEM((N, 9 * Cin, P), jnp.float32),            # im2col matrix
        ],
    )(x_flat, w2d, gamma2, beta2)

    # Free reshape back to NCHW (no transpose).
    return out_flat.reshape(N, Cout, H, W)


def _reference(x_nchw, weight_oihw, gamma, beta):
    """Pure-JAX reference (sanity check)."""
    out = jax.lax.conv_general_dilated(
        x_nchw, weight_oihw, window_strides=(1, 1), padding=((1, 1), (1, 1)),
        dimension_numbers=("NCHW", "OIHW", "NCHW"),
        precision=jax.lax.Precision.HIGHEST)
    mean = jnp.mean(out, axis=(0, 2, 3), keepdims=True)
    var = jnp.mean((out - mean) ** 2, axis=(0, 2, 3), keepdims=True)
    xhat = (out - mean) * jax.lax.rsqrt(var + BN_EPS)
    y = xhat * gamma.reshape(1, -1, 1, 1) + beta.reshape(1, -1, 1, 1)
    return jnp.maximum(y, 0.0)


if __name__ == "__main__":
    # Small shapes consistent with the module: batch=2, C_in=4, C_out=8, 16x16.
    N, C_in, C_out, H, W = 2, 4, 8, 16, 16

    key = jax.random.PRNGKey(0)
    kx, kw = jax.random.split(key)
    x = jax.random.normal(kx, (N, C_in, H, W), dtype=jnp.float32)
    # Conv2d(bias=False) weight; BatchNorm2d default affine params.
    weight = jax.random.normal(kw, (C_out, C_in, 3, 3), dtype=jnp.float32) * 0.1
    gamma = jnp.ones((C_out,), dtype=jnp.float32)
    beta = jnp.zeros((C_out,), dtype=jnp.float32)
    # TODO(synk): Dropout2d is skipped — module default is dropout=None (identity).

    out = conv_block_forward(x, weight, gamma, beta)
    out = jax.block_until_ready(out)

    ref = jax.block_until_ready(_reference(x, weight, gamma, beta))
    assert out.shape == (N, C_out, H, W)
    assert jnp.allclose(out, ref, atol=2e-4, rtol=2e-4)

    print("KERNEL_OK")
</pallas_src>

<mosaic_0001>
module attributes {stable_mosaic.version = 11 : i64} {
  func.func @convblock_kernel(%arg0: memref<2x4x256xf32, #tpu.memory_space<vmem>>, %arg1: memref<8x36xf32, #tpu.memory_space<vmem>>, %arg2: memref<8x1xf32, #tpu.memory_space<vmem>>, %arg3: memref<8x1xf32, #tpu.memory_space<vmem>>, %arg4: memref<2x8x256xf32, #tpu.memory_space<vmem>>, %arg5: memref<2x4x290xf32, #tpu.memory_space<vmem>>, %arg6: memref<2x36x256xf32, #tpu.memory_space<vmem>>) attributes {dimension_semantics = [], scalar_prefetch = 0 : i64, scratch_operands = 2 : i64, tpu.core_type = #tpu.core_type<tc>} {
    %cst = arith.constant 0.000000e+00 : f32
    %0 = vector.broadcast %cst : f32 to vector<2x4x290xf32>
    %c0 = arith.constant 0 : index
    %c0_0 = arith.constant 0 : index
    %c0_1 = arith.constant 0 : index
    %1 = vector.load %arg5[%c0, %c0_0, %c0_1] : memref<2x4x290xf32, #tpu.memory_space<vmem>>, vector<2x4x290xf32>
    tpu.vector_store %arg5[%c0, %c0_0, %c0_1], %0 {strides = array<i32>} : memref<2x4x290xf32, #tpu.memory_space<vmem>>, vector<2x4x290xf32>,
    %c0_2 = arith.constant 0 : index
    %c0_3 = arith.constant 0 : index
    %c0_4 = arith.constant 0 : index
    %2 = vector.load %arg0[%c0_2, %c0_3, %c0_4] : memref<2x4x256xf32, #tpu.memory_space<vmem>>, vector<2x4x256xf32>
    %c0_5 = arith.constant 0 : index
    %c0_6 = arith.constant 0 : index
    %c17 = arith.constant 17 : index
    %3 = vector.load %arg5[%c0_5, %c0_6, %c17] : memref<2x4x290xf32, #tpu.memory_space<vmem>>, vector<2x4x256xf32>
    tpu.vector_store %arg5[%c0_5, %c0_6, %c17], %2 {strides = array<i32>} : memref<2x4x290xf32, #tpu.memory_space<vmem>>, vector<2x4x256xf32>,
    %4 = tpu.iota {dimensions = array<i32: 2>} : vector<1x1x256xi32>
    %c16_i32 = arith.constant 16 : i32
    %c0_i32 = arith.constant 0 : i32
    %5 = arith.cmpi eq, %c16_i32, %c0_i32 : i32
    %c1_i32 = arith.constant 1 : i32
    %6 = arith.select %5, %c1_i32, %c16_i32 : i32
    %7 = vector.broadcast %6 : i32 to vector<1x1x256xi32>
    %8 = arith.remsi %4, %7 : vector<1x1x256xi32>
    %c0_i32_7 = arith.constant 0 : i32
    %9 = vector.broadcast %c0_i32_7 : i32 to vector<1x1x256xi32>
    %10 = arith.cmpi ne, %8, %9 : vector<1x1x256xi32>
    %c0_i32_8 = arith.constant 0 : i32
    %11 = vector.broadcast %c0_i32_8 : i32 to vector<1x1x256xi32>
    %12 = arith.cmpi slt, %8, %11 : vector<1x1x256xi32>
    %c0_i32_9 = arith.constant 0 : i32
    %13 = arith.cmpi slt, %6, %c0_i32_9 : i32
    %14 = vector.broadcast %13 : i1 to vector<1x1x256xi1>
    %15 = vector.broadcast %14 : vector<1x1x256xi1> to vector<1x1x256xi1>
    %16 = arith.xori %12, %15 : vector<1x1x256xi1>
    %17 = arith.andi %16, %10 : vector<1x1x256xi1>
    %18 = vector.broadcast %6 : i32 to vector<1x1x256xi32>
    %19 = arith.addi %8, %18 : vector<1x1x256xi32>
    %20 = arith.select %17, %19, %8 : vector<1x1x256xi1>, vector<1x1x256xi32>
    %c0_i32_10 = arith.constant 0 : i32
    %21 = vector.broadcast %c0_i32_10 : i32 to vector<1x1x256xi32>
    %22 = arith.cmpi sgt, %20, %21 : vector<1x1x256xi32>
    %23 = arith.extui %22 : vector<1x1x256xi1> to vector<1x1x256xi32>
    %24 = arith.sitofp %23 : vector<1x1x256xi32> to vector<1x1x256xf32>
    %c15_i32 = arith.constant 15 : i32
    %25 = vector.broadcast %c15_i32 : i32 to vector<1x1x256xi32>
    %26 = arith.cmpi slt, %20, %25 : vector<1x1x256xi32>
    %27 = arith.extui %26 : vector<1x1x256xi1> to vector<1x1x256xi32>
    %28 = arith.sitofp %27 : vector<1x1x256xi32> to vector<1x1x256xf32>
    %c0_11 = arith.constant 0 : index
    %c0_12 = arith.constant 0 : index
    %c0_13 = arith.constant 0 : index
    %29 = vector.load %arg5[%c0_11, %c0_12, %c0_13] : memref<2x4x290xf32, #tpu.memory_space<vmem>>, vector<2x4x256xf32>
    %30 = vector.broadcast %24 : vector<1x1x256xf32> to vector<2x4x256xf32>
    %31 = arith.mulf %29, %30 : vector<2x4x256xf32>
    %c0_14 = arith.constant 0 : index
    %c0_15 = arith.constant 0 : index
    %c0_16 = arith.constant 0 : index
    %32 = vector.load %arg6[%c0_14, %c0_15, %c0_16] : memref<2x36x256xf32, #tpu.memory_space<vmem>>, vector<2x4x256xf32>
    tpu.vector_store %arg6[%c0_14, %c0_15, %c0_16], %31 {strides = array<i32>} : memref<2x36x256xf32, #tpu.memory_space<vmem>>, vector<2x4x256xf32>,
    %c0_17 = arith.constant 0 : index
    %c0_18 = arith.constant 0 : index
    %c1 = arith.constant 1 : index
    %33 = vector.load %arg5[%c0_17, %c0_18, %c1] : memref<2x4x290xf32, #tpu.memory_space<vmem>>, vector<2x4x256xf32>
    %c0_19 = arith.constant 0 : index
    %c4 = arith.constant 4 : index
    %c0_20 = arith.constant 0 : index
    %34 = vector.load %arg6[%c0_19, %c4, %c0_20] : memref<2x36x256xf32, #tpu.memory_space<vmem>>, vector<2x4x256xf32>
    tpu.vector_store %arg6[%c0_19, %c4, %c0_20], %33 {strides = array<i32>} : memref<2x36x256xf32, #tpu.memory_space<vmem>>, vector<2x4x256xf32>,
    %c0_21 = arith.constant 0 : index
    %c0_22 = arith.constant 0 : index
    %c2 = arith.constant 2 : index
    %35 = vector.load %arg5[%c0_21, %c0_22, %c2] : memref<2x4x290xf32, #tpu.memory_space<vmem>>, vector<2x4x256xf32>
    %36 = vector.broadcast %28 : vector<1x1x256xf32> to vector<2x4x256xf32>
    %37 = arith.mulf %35, %36 : vector<2x4x256xf32>
    %c0_23 = arith.constant 0 : index
    %c8 = arith.constant 8 : index
    %c0_24 = arith.constant 0 : index
    %38 = vector.load %arg6[%c0_23, %c8, %c0_24] : memref<2x36x256xf32, #tpu.memory_space<vmem>>, vector<2x4x256xf32>
    tpu.vector_store %arg6[%c0_23, %c8, %c0_24], %37 {strides = array<i32>} : memref<2x36x256xf32, #tpu.memory_space<vmem>>, vector<2x4x256xf32>,
    %c0_25 = arith.constant 0 : index
    %c0_26 = arith.constant 0 : index
    %c16 = arith.constant 16 : index
    %39 = vector.load %arg5[%c0_25, %c0_26, %c16] : memref<2x4x290xf32, #tpu.memory_space<vmem>>, vector<2x4x256xf32>
    %40 = vector.broadcast %24 : vector<1x1x256xf32> to vector<2x4x256xf32>
    %41 = arith.mulf %39, %40 : vector<2x4x256xf32>
    %c0_27 = arith.constant 0 : index
    %c12 = arith.constant 12 : index
    %c0_28 = arith.constant 0 : index
    %42 = vector.load %arg6[%c0_27, %c12, %c0_28] : memref<2x36x256xf32, #tpu.memory_space<vmem>>, vector<2x4x256xf32>
    tpu.vector_store %arg6[%c0_27, %c12, %c0_28], %41 {strides = array<i32>} : memref<2x36x256xf32, #tpu.memory_space<vmem>>, vector<2x4x256xf32>,
    %c0_29 = arith.constant 0 : index
    %c0_30 = arith.constant 0 : index
    %c17_31 = arith.constant 17 : index
    %43 = vector.load %arg5[%c0_29, %c0_30, %c17_31] : memref<2x4x290xf32, #tpu.memory_space<vmem>>, vector<2x4x256xf32>
    %c0_32 = arith.constant 0 : index
    %c16_33 = arith.constant 16 : index
    %c0_34 = arith.constant 0 : index
    %44 = vector.load %arg6[%c0_32, %c16_33, %c0_34] : memref<2x36x256xf32, #tpu.memory_space<vmem>>, vector<2x4x256xf32>
    tpu.vector_store %arg6[%c0_32, %c16_33, %c0_34], %43 {strides = array<i32>} : memref<2x36x256xf32, #tpu.memory_space<vmem>>, vector<2x4x256xf32>,
    %c0_35 = arith.constant 0 : index
    %c0_36 = arith.constant 0 : index
    %c18 = arith.constant 18 : index
    %45 = vector.load %arg5[%c0_35, %c0_36, %c18] : memref<2x4x290xf32, #tpu.memory_space<vmem>>, vector<2x4x256xf32>
    %46 = vector.broadcast %28 : vector<1x1x256xf32> to vector<2x4x256xf32>
    %47 = arith.mulf %45, %46 : vector<2x4x256xf32>
    %c0_37 = arith.constant 0 : index
    %c20 = arith.constant 20 : index
    %c0_38 = arith.constant 0 : index
    %48 = vector.load %arg6[%c0_37, %c20, %c0_38] : memref<2x36x256xf32, #tpu.memory_space<vmem>>, vector<2x4x256xf32>
    tpu.vector_store %arg6[%c0_37, %c20, %c0_38], %47 {strides = array<i32>} : memref<2x36x256xf32, #tpu.memory_space<vmem>>, vector<2x4x256xf32>,
    %c0_39 = arith.constant 0 : index
    %c0_40 = arith.constant 0 : index
    %c32 = arith.constant 32 : index
    %49 = vector.load %arg5[%c0_39, %c0_40, %c32] : memref<2x4x290xf32, #tpu.memory_space<vmem>>, vector<2x4x256xf32>
    %50 = vector.broadcast %24 : vector<1x1x256xf32> to vector<2x4x256xf32>
    %51 = arith.mulf %49, %50 : vector<2x4x256xf32>
    %c0_41 = arith.constant 0 : index
    %c24 = arith.constant 24 : index
    %c0_42 = arith.constant 0 : index
    %52 = vector.load %arg6[%c0_41, %c24, %c0_42] : memref<2x36x256xf32, #tpu.memory_space<vmem>>, vector<2x4x256xf32>
    tpu.vector_store %arg6[%c0_41, %c24, %c0_42], %51 {strides = array<i32>} : memref<2x36x256xf32, #tpu.memory_space<vmem>>, vector<2x4x256xf32>,
    %c0_43 = arith.constant 0 : index
    %c0_44 = arith.constant 0 : index
    %c33 = arith.constant 33 : index
    %53 = vector.load %arg5[%c0_43, %c0_44, %c33] : memref<2x4x290xf32, #tpu.memory_space<vmem>>, vector<2x4x256xf32>
    %c0_45 = arith.constant 0 : index
    %c28 = arith.constant 28 : index
    %c0_46 = arith.constant 0 : index
    %54 = vector.load %arg6[%c0_45, %c28, %c0_46] : memref<2x36x256xf32, #tpu.memory_space<vmem>>, vector<2x4x256xf32>
    tpu.vector_store %arg6[%c0_45, %c28, %c0_46], %53 {strides = array<i32>} : memref<2x36x256xf32, #tpu.memory_space<vmem>>, vector<2x4x256xf32>,
    %c0_47 = arith.constant 0 : index
    %c0_48 = arith.constant 0 : index
    %c34 = arith.constant 34 : index
    %55 = vector.load %arg5[%c0_47, %c0_48, %c34] : memref<2x4x290xf32, #tpu.memory_space<vmem>>, vector<2x4x256xf32>
    %56 = vector.broadcast %28 : vector<1x1x256xf32> to vector<2x4x256xf32>
    %57 = arith.mulf %55, %56 : vector<2x4x256xf32>
    %c0_49 = arith.constant 0 : index
    %c32_50 = arith.constant 32 : index
    %c0_51 = arith.constant 0 : index
    %58 = vector.load %arg6[%c0_49, %c32_50, %c0_51] : memref<2x36x256xf32, #tpu.memory_space<vmem>>, vector<2x4x256xf32>
    tpu.vector_store %arg6[%c0_49, %c32_50, %c0_51], %57 {strides = array<i32>} : memref<2x36x256xf32, #tpu.memory_space<vmem>>, vector<2x4x256xf32>,
    %c0_52 = arith.constant 0 : index
    %c0_53 = arith.constant 0 : index
    %59 = vector.load %arg1[%c0_52, %c0_53] : memref<8x36xf32, #tpu.memory_space<vmem>>, vector<8x36xf32>
    %c0_54 = arith.constant 0 : index
    %c0_55 = arith.constant 0 : index
    %c0_56 = arith.constant 0 : index
    %60 = vector.load %arg6[%c0_54, %c0_55, %c0_56] : memref<2x36x256xf32, #tpu.memory_space<vmem>>, vector<1x36x256xf32>
    %61 = vector.shape_cast %60 : vector<1x36x256xf32> to vector<36x256xf32>
    %cst_57 = arith.constant dense<0.000000e+00> : vector<8x256xf32>
    %62 = tpu.matmul %59, %61, %cst_57 {dimension_numbers = #tpu.dot_dimension_numbers<[1], [0], [0], [1], [0, 0, 1, 1], [], []>} : vector<8x36xf32>, vector<36x256xf32>, vector<8x256xf32> -> vector<8x256xf32>
    %c1_58 = arith.constant 1 : index
    %c0_59 = arith.constant 0 : index
    %c0_60 = arith.constant 0 : index
    %63 = vector.load %arg6[%c1_58, %c0_59, %c0_60] : memref<2x36x256xf32, #tpu.memory_space<vmem>>, vector<1x36x256xf32>
    %64 = vector.shape_cast %63 : vector<1x36x256xf32> to vector<36x256xf32>
    %cst_61 = arith.constant dense<0.000000e+00> : vector<8x256xf32>
    %65 = tpu.matmul %59, %64, %cst_61 {dimension_numbers = #tpu.dot_dimension_numbers<[1], [0], [0], [1], [0, 0, 1, 1], [], []>} : vector<8x36xf32>, vector<36x256xf32>, vector<8x256xf32> -> vector<8x256xf32>
    %cst_62 = arith.constant dense<0.000000e+00> : vector<8xf32>
    %66 = vector.multi_reduction <add>, %62, %cst_62 [1] : vector<8x256xf32> to vector<8xf32>
    %67 = vector.shape_cast %66 : vector<8xf32> to vector<8x1xf32>
    %cst_63 = arith.constant 0.000000e+00 : f32
    %68 = vector.broadcast %cst_63 : f32 to vector<8x1xf32>
    %69 = arith.addf %68, %67 : vector<8x1xf32>
    %cst_64 = arith.constant dense<0.000000e+00> : vector<8xf32>
    %70 = vector.multi_reduction <add>, %65, %cst_64 [1] : vector<8x256xf32> to vector<8xf32>
    %71 = vector.shape_cast %70 : vector<8xf32> to vector<8x1xf32>
    %72 = arith.addf %69, %71 : vector<8x1xf32>
    %73 = arith.mulf %62, %62 : vector<8x256xf32>
    %cst_65 = arith.constant dense<0.000000e+00> : vector<8xf32>
    %74 = vector.multi_reduction <add>, %73, %cst_65 [1] : vector<8x256xf32> to vector<8xf32>
    %75 = vector.shape_cast %74 : vector<8xf32> to vector<8x1xf32>
    %cst_66 = arith.constant 0.000000e+00 : f32
    %76 = vector.broadcast %cst_66 : f32 to vector<8x1xf32>
    %77 = arith.addf %76, %75 : vector<8x1xf32>
    %78 = arith.mulf %65, %65 : vector<8x256xf32>
    %cst_67 = arith.constant dense<0.000000e+00> : vector<8xf32>
    %79 = vector.multi_reduction <add>, %78, %cst_67 [1] : vector<8x256xf32> to vector<8xf32>
    %80 = vector.shape_cast %79 : vector<8xf32> to vector<8x1xf32>
    %81 = arith.addf %77, %80 : vector<8x1xf32>
    %cst_68 = arith.constant 0.001953125 : f32
    %82 = vector.broadcast %cst_68 : f32 to vector<8x1xf32>
    %83 = arith.mulf %72, %82 : vector<8x1xf32>
    %cst_69 = arith.constant 0.001953125 : f32
    %84 = vector.broadcast %cst_69 : f32 to vector<8x1xf32>
    %85 = arith.mulf %81, %84 : vector<8x1xf32>
    %86 = arith.mulf %83, %83 : vector<8x1xf32>
    %87 = arith.subf %85, %86 : vector<8x1xf32>
    %c0_70 = arith.constant 0 : index
    %c0_71 = arith.constant 0 : index
    %88 = vector.load %arg2[%c0_70, %c0_71] : memref<8x1xf32, #tpu.memory_space<vmem>>, vector<8x1xf32>
    %cst_72 = arith.constant 9.99999974E-6 : f32
    %89 = vector.broadcast %cst_72 : f32 to vector<8x1xf32>
    %90 = arith.addf %87, %89 : vector<8x1xf32>
    %91 = math.rsqrt %90 : vector<8x1xf32>
    %92 = arith.mulf %88, %91 : vector<8x1xf32>
    %c0_73 = arith.constant 0 : index
    %c0_74 = arith.constant 0 : index
    %93 = vector.load %arg3[%c0_73, %c0_74] : memref<8x1xf32, #tpu.memory_space<vmem>>, vector<8x1xf32>
    %94 = arith.mulf %83, %92 : vector<8x1xf32>
    %95 = arith.subf %93, %94 : vector<8x1xf32>
    %96 = vector.broadcast %92 : vector<8x1xf32> to vector<8x256xf32>
    %97 = arith.mulf %62, %96 : vector<8x256xf32>
    %98 = vector.broadcast %95 : vector<8x1xf32> to vector<8x256xf32>
    %99 = arith.addf %97, %98 : vector<8x256xf32>
    %cst_75 = arith.constant 0.000000e+00 : f32
    %100 = vector.broadcast %cst_75 : f32 to vector<8x256xf32>
    %101 = arith.maximumf %99, %100 : vector<8x256xf32>
    %c0_76 = arith.constant 0 : index
    %c0_77 = arith.constant 0 : index
    %c0_78 = arith.constant 0 : index
    %102 = vector.load %arg4[%c0_76, %c0_77, %c0_78] : memref<2x8x256xf32, #tpu.memory_space<vmem>>, vector<1x8x256xf32>
    %103 = vector.shape_cast %102 : vector<1x8x256xf32> to vector<8x256xf32>
    %104 = vector.shape_cast %101 : vector<8x256xf32> to vector<1x8x256xf32>
    tpu.vector_store %arg4[%c0_76, %c0_77, %c0_78], %104 {strides = array<i32>} : memref<2x8x256xf32, #tpu.memory_space<vmem>>, vector<1x8x256xf32>,
    %105 = vector.broadcast %92 : vector<8x1xf32> to vector<8x256xf32>
    %106 = arith.mulf %65, %105 : vector<8x256xf32>
    %107 = vector.broadcast %95 : vector<8x1xf32> to vector<8x256xf32>
    %108 = arith.addf %106, %107 : vector<8x256xf32>
    %cst_79 = arith.constant 0.000000e+00 : f32
    %109 = vector.broadcast %cst_79 : f32 to vector<8x256xf32>
    %110 = arith.maximumf %108, %109 : vector<8x256xf32>
    %c1_80 = arith.constant 1 : index
    %c0_81 = arith.constant 0 : index
    %c0_82 = arith.constant 0 : index
    %111 = vector.load %arg4[%c1_80, %c0_81, %c0_82] : memref<2x8x256xf32, #tpu.memory_space<vmem>>, vector<1x8x256xf32>
    %112 = vector.shape_cast %111 : vector<1x8x256xf32> to vector<8x256xf32>
    %113 = vector.shape_cast %110 : vector<8x256xf32> to vector<1x8x256xf32>
    tpu.vector_store %arg4[%c1_80, %c0_81, %c0_82], %113 {strides = array<i32>} : memref<2x8x256xf32, #tpu.memory_space<vmem>>, vector<1x8x256xf32>,
    return
  }
}

</mosaic_0001>

<bundles_post_ra>
// kernel: tpu_custom_call.1
= control target key start
LH: loop header
LB: loop body
LE: loop exit
PB: predicated region body
PF: predicated region fallthrough
CT: control target
= control target key end

     0   :  { %9 = vsyncpa [#allocation5], 0  ;;  %s1021_s0 = inlined_call_operand.vmem [shape: f32[2,4,256], index: 0, kind: input, shape index: {}]   ;;  %s1022_s1 = inlined_call_operand.hbm [shape: f32[8,36], index: 1, kind: input, shape index: {}]   ;;  %s1023_s2 = inlined_call_operand.vmem [shape: f32[8,1], index: 2, kind: input, shape index: {}]   ;;  %s1024_s3 = inlined_call_operand.vmem [shape: f32[8,1], index: 3, kind: input, shape index: {}]   ;;  %s1025_s4 = inlined_call_operand.hbm [shape: f32[2,8,256], index: 4, kind: output, shape index: {}]  }
   0x1   :  { %10 = vsyncpa [#allocation6], 0  ;;  %s18_s17 = sshll.u32 %s1022_s1, 4  ;;  %s851_s18 = smov [#allocation4]   ;;  %s19_s17 = int_to_ptr.hbm [resolvable:$true] %s18_s17 }
   0x2   :  { %s20_s19 = sshll.u32 %s851_s18, 4  ;;  %s21_s19 = int_to_ptr.vmem [resolvable:$true] %s20_s19 }
   0x3   :  { %23 = dma.hbm_to_vmem [thread:$0]  %s19_s17, 128, %s21_s19, [#allocation5]  }
   0x4   :  { %847 = dma.done.wait [#allocation5], 128  }
   0x5   :  { %848 = vsyncadd [#allocation5], 4294967168  ;;  %v62_v0 = vlaneseq  ;;  %v852_v1 = vmov 0.0   ;;  %v37_v6 = vld [vmem:[%s1021_s0] sm:$0xff]  ;;  %s853_s1 = smov 17   ;;  %vm106_vm3 = vcmask 1043456  }
   0x6   :  { %32 = vst [vmem:[#allocation2] sm:$0xff] %v852_v1  ;;  %41 = vrot.lane.b32.xlu0 %v37_v6, %s853_s1  ;;  %s854_s22 = smov 2   ;;  %v38_v12 = vld [vmem:[%s1021_s0 + $0x8] sm:$0xff]  ;;  %s855_s25 = smov 18   ;;  %vm33_vm5 = vcmask 273408   ;;  %vm54_vm6 = vcmask 1043592  }
   0x7   :  { %v63_v2 = vand.u32 127, %v62_v0  ;;  %35 = vst [vmem:[#allocation2 + $0xc] sm:$0xff] %v852_v1  ;;  %s856_s26 = smov 16   ;;  %s857_s27 = smov 32   ;;  %vm55_vm7 = vcmask 1047556   ;;  %vm47_vm8 = vcmask 138240  }
   0x8   :  { %s858_s28 = smov 34   ;;  %34 = vst.msk [vmem:[#allocation2 + $0x8] sm:$0xf] %vm33_vm5, %v852_v1  ;;  %vm58_vm9 = vcmask 134144   ;;  %vm56_vm10 = vmor %vm55_vm7, %vm54_vm6  ;;  %vm186_vm11 = vcmask 15360   ;;  %s859_s0 = smov 127  }
   0x9   :  { %v64_v3 = vadd.s32 128, %v63_v2  ;;  %v69_v4 = vand.u32 15, %v63_v2  ;;  %36 = vst.msk [vmem:[#allocation2 + $0x14] sm:$0xf] %vm33_vm5, %v852_v1  ;;  %vm243_vm12 = vcmask 130048   ;;  %s860_s29 = smov 126  }
   0xa   :  { %s861_s30 = smov 112   ;;  %vm347_vm13 = vcmask 146432   ;;  %vm405_vm14 = vcmask 261120   ;;  %s862_s5 = smov 111   ;;  %vm509_vm15 = vcmask 277504   ;;  %vm385_vm5 = vcmask 900096  }
   0xb   :  { %v76_v5 = vand.u32 15, %v64_v3  ;;  %vm95_vm0 = vcmp.lt.s32.totalorder %v69_v4, 15  ;;  %vm89_vm4 = vcmp.gt.s32.totalorder %v69_v4, 0  ;;  %s863_s6 = smov 110   ;;  %s864_s7 = smov 96   ;;  %vm442_vm6 = vcmask 785408  }
   0xc   :  { %v765_v7 = vsel %vm95_vm0, 1.0, %v852_v1  ;;  %v763_v14 = vsel %vm89_vm4, 1.0, %v852_v1  ;;  %s865_s8 = smov 95   ;;  %s866_s9 = smov 94   ;;  %vm162_vm0 = vcmask 1039360   ;;  %vm327_vm4 = vcmask 908288  }
   0xd   :  { %vm96_vm1 = vcmp.lt.s32.totalorder %v76_v5, 15  ;;  %vm90_vm2 = vcmp.gt.s32.totalorder %v76_v5, 0  ;;  %vm489_vm7 = vcmask 777216   ;;  %s750_s16 = sshll.u32 %s1025_s4, 4  ;;  %s869_s17 = smov 256   ;;  %s751_s16 = int_to_ptr.hbm [resolvable:$true] %s750_s16 }
   0xe   :  { %v766_v8 = vsel %vm96_vm1, 1.0, %v852_v1  ;;  %v764_v10 = vsel %vm90_vm2, 1.0, %v852_v1  ;;  %43 = vrot.lane.b32.xlu0 %v38_v12, %s853_s1  ;;  %vm223_vm1 = vcmask 1031168   ;;  %vm281_vm2 = vcmask 916480  }
   0xf   :  { %v181_v9 = vrot.slane %v766_v8, 4  ;;  %v105_v13 = vrot.slane %v764_v10, 4 }
  0x11   :  { %v182_v11 = vsel %vm106_vm3, %v765_v7, %v181_v9  ;;  %v107_v15 = vsel %vm106_vm3, %v763_v14, %v105_v13 }
  0x12   :  { %183 = vrot.lane.b32.xlu1 %v182_v11, %s854_s22  ;;  %344 = vrot.lane.b32.xlu2 %v182_v11, %s855_s25 }
  0x16   :  { %506 = vrot.lane.b32.xlu0 %v182_v11, %s858_s28 }
  0x1a   :  { %240 = vrot.lane.b32.xlu1 %v107_v15, %s856_s26  ;;  %402 = vrot.lane.b32.xlu2 %v107_v15, %s857_s27 }
  0x6c   :  { %v345_v59 = vpop.permute.xlu2 %344 }
  0x6d   :  { %v346_v2 = vrot.slane %v345_v59, 4 }
  0x6f   :  { %v348_v9 = vsel %vm347_vm13, %v346_v2, %v345_v59 }
  0x74   :  { %v403_v10 = vpop.permute.xlu2 %402 }
  0x78   :  { %v42_v16 = vpop.permute.xlu0 %41 }
  0x79   :  { %v45_v17 = vrot.slane %v42_v16, 4 }
  0x7b   :  { %v48_v18 = vsel %vm47_vm8, %v45_v17, %v42_v16  ;;  %59 = vst.msk [vmem:[#allocation2 + $0x8] sm:$0xf] %vm58_vm9, %v45_v17 }
  0x7c   :  { %57 = vst.msk [vmem:[#allocation2] sm:$0xff] %vm56_vm10, %v48_v18 }
  0x80   :  { %v44_v19 = vpop.permute.xlu0 %43 }
  0x81   :  { %v46_v20 = vrot.slane %v44_v19, 4 }
  0x82   :  { %v129_v44 = vld [vmem:[#allocation2 + $0x8] sm:$0xf] }
  0x83   :  { %v907_v21 = vld [vmem:[#allocation2] sm:$0xff]  ;;  %v49_v22 = vsel %vm47_vm8, %v46_v20, %v44_v19  ;;  %61 = vst.msk [vmem:[#allocation2 + $0x14] sm:$0xf] %vm58_vm9, %v46_v20  ;;  %v176_v50 = vld [vmem:[#allocation2 + $0x8] sm:$0xf]  ;;  %vm546_vm8 = vcmask 769024  }
  0x84   :  { %v109_v23 = vmul.f32 %v107_v15, %v907_v21  ;;  %60 = vst.msk [vmem:[#allocation2 + $0xc] sm:$0xff] %vm56_vm10, %v49_v22  ;;  %v184_v24 = vpop.permute.xlu1 %183  ;;  %v237_v63 = vld [vmem:[#allocation2 + $0x8] sm:$0xf]  ;;  %v351_v20 = vmul.f32 %v348_v9, %v907_v21  ;;  %vm570_vm9 = vcmask 293888  }
  0x85   :  { %v185_v27 = vrot.slane %v184_v24, 4  ;;  %v295_v17 = vld [vmem:[#allocation2 + $0x8] sm:$0xf] }
  0x86   :  { %113 = vst [vmem:[#allocation1] ss:$2 sm:$0xff] %v109_v23 }
  0x87   :  { %v187_v32 = vsel %vm186_vm11, %v185_v27, %v184_v24  ;;  %v191_v57 = vmul.f32 %v185_v27, %v176_v50  ;;  %v341_v24 = vld [vmem:[#allocation2 + $0x8] sm:$0xf] }
  0x88   :  { %v190_v36 = vmul.f32 %v187_v32, %v907_v21 }
  0x8a   :  { %v131_v25 = vld [vmem:[#allocation2 + $0x14] sm:$0xf] }
  0x8b   :  { %v910_v26 = vld [vmem:[#allocation2 + $0xc] sm:$0xff]  ;;  %146 = vst [vmem:[#allocation1 + $0x31] ss:$2 sm:$0xff] %v131_v25  ;;  %v178_v31 = vld [vmem:[#allocation2 + $0x14] sm:$0xf] }
  0x8c   :  { %144 = vst [vmem:[#allocation1 + $0x21] ss:$2 sm:$0xff] %v910_v26  ;;  %v110_v30 = vmul.f32 %v107_v15, %v910_v26  ;;  %v193_v33 = vmul.f32 %v185_v27, %v178_v31  ;;  %v241_v37 = vpop.permute.xlu1 %240  ;;  %v192_v41 = vmul.f32 %v187_v32, %v910_v26  ;;  %v239_v42 = vld [vmem:[#allocation2 + $0x14] sm:$0xf]  ;;  %v353_v11 = vmul.f32 %v348_v9, %v910_v26 }
  0x8d   :  { %v114_v28 = vld.sshfl [vmem:[#allocation1] sm:$0xff pattern:$0x75316420]  ;;  %v115_v29 = vld.sshfl [vmem:[#allocation1 + $0x8] sm:$0xff pattern:$0x75316420] }
  0x8e   :  { %137 = vst [vmem:[#allocation1 + $0x1] ss:$2 sm:$0xff] %v907_v21  ;;  %v242_v43 = vrot.slane %v241_v37, 4  ;;  %v297_v61 = vld [vmem:[#allocation2 + $0x14] sm:$0xf]  ;;  %v404_v15 = vrot.slane %v403_v10, 4 }
  0x8f   :  { %124 = vst [vmem:[#allocation3] sm:$0xf] %v114_v28  ;;  %v343_v62 = vld [vmem:[#allocation2 + $0x14] sm:$0xf] }
  0x90   :  { %125 = vst [vmem:[#allocation3 + $0x68] sm:$0xf] %v115_v29  ;;  %v250_v47 = vmul.f32 %v242_v43, %v239_v42  ;;  %v244_v49 = vsel %vm243_vm12, %v242_v43, %v241_v37  ;;  %v248_v3 = vmul.f32 %v242_v43, %v237_v63  ;;  %v354_v7 = vmul.f32 %v346_v2, %v343_v62  ;;  %v401_v12 = vld [vmem:[#allocation2 + $0x14] sm:$0xf]  ;;  %v399_v37 = vld [vmem:[#allocation2 + $0x8] sm:$0xf] }
  0x91   :  { %117 = vst [vmem:[#allocation1 + $0x10] ss:$2 sm:$0xff] %v110_v30  ;;  %v249_v51 = vmul.f32 %v244_v49, %v910_v26  ;;  %v247_v54 = vmul.f32 %v244_v49, %v907_v21  ;;  %v412_v18 = vmul.f32 %v404_v15, %v401_v12  ;;  %v406_v25 = vsel %vm405_vm14, %v404_v15, %v403_v10  ;;  %v458_v32 = vld [vmem:[#allocation2 + $0x14] sm:$0xf] }
  0x92   :  { %v149_v34 = vld.sshfl [vmem:[#allocation1 + $0x30] sm:$0xff pattern:$0x75316420]  ;;  %v411_v27 = vmul.f32 %v406_v25, %v910_v26  ;;  %v352_v30 = vmul.f32 %v346_v2, %v341_v24 }
  0x93   :  { %160 = vrot.lane.b32.xlu0 %v149_v34, %s859_s0  ;;  %207 = vst [vmem:[#allocation1 + $0x30] ss:$2 sm:$0xff] %v193_v33  ;;  %v148_v35 = vld.sshfl [vmem:[#allocation1 + $0x28] sm:$0xff pattern:$0x75316420]  ;;  %v507_v33 = vpop.permute.xlu0 %506 }
  0x94   :  { %158 = vrot.lane.b32.xlu2 %v148_v35, %s859_s0  ;;  %v147_v38 = vld.sshfl [vmem:[#allocation1 + $0x20] sm:$0xff pattern:$0x75316420]  ;;  %v409_v35 = vmul.f32 %v406_v25, %v907_v21  ;;  %v508_v42 = vrot.slane %v507_v33, 4 }
  0x95   :  { %v918_v39 = vld.sshfl [vmem:[#allocation1] sm:$0xff pattern:$0x75316420]  ;;  %v920_v40 = vld.sshfl [vmem:[#allocation1 + $0x8] sm:$0xff pattern:$0x75316420]  ;;  %156 = vrot.lane.b32.xlu1 %v147_v38, %s859_s0 }
  0x96   :  { %198 = vst [vmem:[#allocation1] ss:$2 sm:$0xff] %v190_v36 }
  0x97   :  { %205 = vst [vmem:[#allocation1 + $0x20] ss:$2 sm:$0xff] %v192_v41  ;;  %v505_v41 = vld [vmem:[#allocation2 + $0x14] sm:$0xf] }
  0x98   :  { %v118_v45 = vld.sshfl [vmem:[#allocation1 + $0x10] sm:$0xff pattern:$0x75316420]  ;;  %v119_v46 = vld.sshfl [vmem:[#allocation1 + $0x18] sm:$0xff pattern:$0x75316420] }
  0x99   :  { %139 = vst [vmem:[#allocation1 + $0x11] ss:$2 sm:$0xff] %v129_v44 }
  0x9a   :  { %v210_v48 = vld.sshfl [vmem:[#allocation1 + $0x30] sm:$0xff pattern:$0x75316420]  ;;  %126 = vst [vmem:[#allocation3 + $0x70] sm:$0xf] %v118_v45  ;;  %v410_v45 = vmul.f32 %v404_v15, %v399_v37 }
  0x9b   :  { %221 = vrot.lane.b32.xlu0 %v210_v48, %s860_s29  ;;  %265 = vst [vmem:[#allocation1 + $0x31] ss:$2 sm:$0xff] %v250_v47  ;;  %v516_v47 = vmul.f32 %v508_v42, %v505_v41  ;;  %v510_v48 = vsel %vm509_vm15, %v508_v42, %v507_v33 }
  0x9c   :  { %127 = vst [vmem:[#allocation3 + $0x58] sm:$0xf] %v119_v46 }
  0x9d   :  { %v202_v52 = vld.sshfl [vmem:[#allocation1 + $0x8] sm:$0xff pattern:$0x75316420]  ;;  %v201_v53 = vld.sshfl [vmem:[#allocation1] sm:$0xff pattern:$0x75316420] }
  0x9e   :  { %v209_v55 = vld.sshfl [vmem:[#allocation1 + $0x28] sm:$0xff pattern:$0x75316420]  ;;  %v208_v56 = vld.sshfl [vmem:[#allocation1 + $0x20] sm:$0xff pattern:$0x75316420] }
  0x9f   :  { %219 = vrot.lane.b32.xlu2 %v209_v55, %s860_s29  ;;  %217 = vrot.lane.b32.xlu1 %v208_v56, %s860_s29  ;;  %263 = vst [vmem:[#allocation1 + $0x21] ss:$2 sm:$0xff] %v249_v51  ;;  %v456_v55 = vld [vmem:[#allocation2 + $0x8] sm:$0xf] }
  0xa0   :  { %v929_v58 = vld.sshfl [vmem:[#allocation1 + $0x10] sm:$0xff pattern:$0x75316420]  ;;  %256 = vst [vmem:[#allocation1 + $0x1] ss:$2 sm:$0xff] %v247_v54 }
  0xa1   :  { %200 = vst [vmem:[#allocation1 + $0x10] ss:$2 sm:$0xff] %v191_v57  ;;  %v513_v57 = vmul.f32 %v510_v48, %v907_v21 }
  0xa2   :  { %v268_v60 = vld.sshfl [vmem:[#allocation1 + $0x30] sm:$0xff pattern:$0x75316420] }
  0xa3   :  { %279 = vrot.lane.b32.xlu0 %v268_v60, %s861_s30  ;;  %311 = vst [vmem:[#allocation1 + $0x30] ss:$2 sm:$0xff] %v297_v61 }
  0xa6   :  { %v267_v0 = vld.sshfl [vmem:[#allocation1 + $0x28] sm:$0xff pattern:$0x75316420]  ;;  %v266_v1 = vld.sshfl [vmem:[#allocation1 + $0x20] sm:$0xff pattern:$0x75316420] }
  0xa7   :  { %277 = vrot.lane.b32.xlu2 %v267_v0, %s861_s30  ;;  %275 = vrot.lane.b32.xlu1 %v266_v1, %s861_s30  ;;  %309 = vst [vmem:[#allocation1 + $0x20] ss:$2 sm:$0xff] %v910_v26  ;;  %v260_v4 = vld.sshfl [vmem:[#allocation1 + $0x8] sm:$0xff pattern:$0x75316420] }
  0xa8   :  { %v203_v5 = vld.sshfl [vmem:[#allocation1 + $0x10] sm:$0xff pattern:$0x75316420]  ;;  %v259_v6 = vld.sshfl [vmem:[#allocation1] sm:$0xff pattern:$0x75316420] }
  0xa9   :  { %258 = vst [vmem:[#allocation1 + $0x11] ss:$2 sm:$0xff] %v248_v3 }
  0xaa   :  { %v314_v8 = vld.sshfl [vmem:[#allocation1 + $0x30] sm:$0xff pattern:$0x75316420]  ;;  %302 = vst [vmem:[#allocation1] ss:$2 sm:$0xff] %v907_v21 }
  0xab   :  { %215 = vrot.lane.b32.xlu0 %v203_v5, %s860_s29  ;;  %369 = vst [vmem:[#allocation1 + $0x31] ss:$2 sm:$0xff] %v354_v7 }
  0xae   :  { %v313_v13 = vld.sshfl [vmem:[#allocation1 + $0x28] sm:$0xff pattern:$0x75316420]  ;;  %v312_v14 = vld.sshfl [vmem:[#allocation1 + $0x20] sm:$0xff pattern:$0x75316420] }
  0xaf   :  { %213 = vrot.lane.b32.xlu2 %v202_v52, %s860_s29  ;;  %211 = vrot.lane.b32.xlu1 %v201_v53, %s860_s29  ;;  %367 = vst [vmem:[#allocation1 + $0x21] ss:$2 sm:$0xff] %v353_v11  ;;  %v515_v52 = vmul.f32 %v510_v48, %v910_v26 }
  0xb0   :  { %v261_v16 = vld.sshfl [vmem:[#allocation1 + $0x10] sm:$0xff pattern:$0x75316420] }
  0xb1   :  { %304 = vst [vmem:[#allocation1 + $0x10] ss:$2 sm:$0xff] %v295_v17  ;;  %v940_v19 = vld.sshfl [vmem:[#allocation1 + $0x8] sm:$0xff pattern:$0x75316420] }
  0xb2   :  { %v372_v22 = vld.sshfl [vmem:[#allocation1 + $0x30] sm:$0xff pattern:$0x75316420]  ;;  %v305_v23 = vld.sshfl [vmem:[#allocation1] sm:$0xff pattern:$0x75316420] }
  0xb3   :  { %325 = vrot.lane.b32.xlu0 %v314_v8, %s862_s5  ;;  %426 = vst [vmem:[#allocation1 + $0x30] ss:$2 sm:$0xff] %v412_v18 }
  0xb4   :  { %360 = vst [vmem:[#allocation1 + $0x1] ss:$2 sm:$0xff] %v351_v20 }
  0xb6   :  { %v371_v28 = vld.sshfl [vmem:[#allocation1 + $0x28] sm:$0xff pattern:$0x75316420]  ;;  %v370_v29 = vld.sshfl [vmem:[#allocation1 + $0x20] sm:$0xff pattern:$0x75316420] }
  0xb7   :  { %323 = vrot.lane.b32.xlu2 %v313_v13, %s862_s5  ;;  %321 = vrot.lane.b32.xlu1 %v312_v14, %s862_s5  ;;  %424 = vst [vmem:[#allocation1 + $0x20] ss:$2 sm:$0xff] %v411_v27 }
  0xb8   :  { %v307_v31 = vld.sshfl [vmem:[#allocation1 + $0x10] sm:$0xff pattern:$0x75316420] }
  0xb9   :  { %362 = vst [vmem:[#allocation1 + $0x11] ss:$2 sm:$0xff] %v352_v30 }
  0xba   :  { %v429_v34 = vld.sshfl [vmem:[#allocation1 + $0x30] sm:$0xff pattern:$0x75316420] }
  0xbb   :  { %273 = vrot.lane.b32.xlu0 %v261_v16, %s861_s30  ;;  %473 = vst [vmem:[#allocation1 + $0x31] ss:$2 sm:$0xff] %v458_v32  ;;  %v364_v36 = vld.sshfl [vmem:[#allocation1 + $0x8] sm:$0xff pattern:$0x75316420] }
  0xbc   :  { %v363_v38 = vld.sshfl [vmem:[#allocation1] sm:$0xff pattern:$0x75316420] }
  0xbd   :  { %417 = vst [vmem:[#allocation1] ss:$2 sm:$0xff] %v409_v35 }
  0xbe   :  { %v428_v43 = vld.sshfl [vmem:[#allocation1 + $0x28] sm:$0xff pattern:$0x75316420]  ;;  %v427_v44 = vld.sshfl [vmem:[#allocation1 + $0x20] sm:$0xff pattern:$0x75316420] }
  0xbf   :  { %271 = vrot.lane.b32.xlu2 %v260_v4, %s861_s30  ;;  %269 = vrot.lane.b32.xlu1 %v259_v6, %s861_s30  ;;  %471 = vst [vmem:[#allocation1 + $0x21] ss:$2 sm:$0xff] %v910_v26  ;;  %v503_v26 = vld [vmem:[#allocation2 + $0x8] sm:$0xf] }
  0xc0   :  { %v365_v46 = vld.sshfl [vmem:[#allocation1 + $0x10] sm:$0xff pattern:$0x75316420]  ;;  %v514_v61 = vmul.f32 %v508_v42, %v503_v26 }
  0xc1   :  { %419 = vst [vmem:[#allocation1 + $0x10] ss:$2 sm:$0xff] %v410_v45 }
  0xc2   :  { %v476_v49 = vld.sshfl [vmem:[#allocation1 + $0x30] sm:$0xff pattern:$0x75316420] }
  0xc3   :  { %383 = vrot.lane.b32.xlu0 %v372_v22, %s863_s6  ;;  %530 = vst [vmem:[#allocation1 + $0x30] ss:$2 sm:$0xff] %v516_v47 }
  0xc4   :  { %v421_v50 = vld.sshfl [vmem:[#allocation1 + $0x8] sm:$0xff pattern:$0x75316420]  ;;  %v420_v51 = vld.sshfl [vmem:[#allocation1] sm:$0xff pattern:$0x75316420] }
  0xc5   :  { %464 = vst [vmem:[#allocation1 + $0x1] ss:$2 sm:$0xff] %v907_v21 }
  0xc6   :  { %v475_v53 = vld.sshfl [vmem:[#allocation1 + $0x28] sm:$0xff pattern:$0x75316420]  ;;  %v474_v54 = vld.sshfl [vmem:[#allocation1 + $0x20] sm:$0xff pattern:$0x75316420] }
  0xc7   :  { %381 = vrot.lane.b32.xlu2 %v371_v28, %s863_s6  ;;  %379 = vrot.lane.b32.xlu1 %v370_v29, %s863_s6  ;;  %528 = vst [vmem:[#allocation1 + $0x20] ss:$2 sm:$0xff] %v515_v52 }
  0xc8   :  { %v422_v56 = vld.sshfl [vmem:[#allocation1 + $0x10] sm:$0xff pattern:$0x75316420] }
  0xc9   :  { %466 = vst [vmem:[#allocation1 + $0x11] ss:$2 sm:$0xff] %v456_v55 }
  0xca   :  { %v533_v63 = vld.sshfl [vmem:[#allocation1 + $0x30] sm:$0xff pattern:$0x75316420] }
  0xcb   :  { %319 = vrot.lane.b32.xlu0 %v307_v31, %s862_s5 }
  0xcc   :  { %v468_v59 = vld.sshfl [vmem:[#allocation1 + $0x8] sm:$0xff pattern:$0x75316420]  ;;  %v467_v60 = vld.sshfl [vmem:[#allocation1] sm:$0xff pattern:$0x75316420] }
  0xcd   :  { %521 = vst [vmem:[#allocation1] ss:$2 sm:$0xff] %v513_v57 }
  0xce   :  { %v532_v0 = vld.sshfl [vmem:[#allocation1 + $0x28] sm:$0xff pattern:$0x75316420]  ;;  %v531_v1 = vld.sshfl [vmem:[#allocation1 + $0x20] sm:$0xff pattern:$0x75316420] }
  0xcf   :  { %317 = vrot.lane.b32.xlu2 %v940_v19, %s862_s5  ;;  %315 = vrot.lane.b32.xlu1 %v305_v23, %s862_s5 }
  0xd0   :  { %v469_v62 = vld.sshfl [vmem:[#allocation1 + $0x10] sm:$0xff pattern:$0x75316420] }
  0xd1   :  { %523 = vst [vmem:[#allocation1 + $0x10] ss:$2 sm:$0xff] %v514_v61 }
  0xd3   :  { %440 = vrot.lane.b32.xlu0 %v429_v34, %s864_s7 }
  0xd4   :  { %v525_v6 = vld.sshfl [vmem:[#allocation1 + $0x8] sm:$0xff pattern:$0x75316420]  ;;  %v524_v7 = vld.sshfl [vmem:[#allocation1] sm:$0xff pattern:$0x75316420] }
  0xd7   :  { %438 = vrot.lane.b32.xlu2 %v428_v43, %s864_s7  ;;  %436 = vrot.lane.b32.xlu1 %v427_v44, %s864_s7 }
  0xd8   :  { %v526_v4 = vld.sshfl [vmem:[#allocation1 + $0x10] sm:$0xff pattern:$0x75316420] }
  0xdb   :  { %377 = vrot.lane.b32.xlu0 %v365_v46, %s863_s6 }
  0xdf   :  { %375 = vrot.lane.b32.xlu2 %v364_v36, %s863_s6  ;;  %373 = vrot.lane.b32.xlu1 %v363_v38, %s863_s6 }
  0xe3   :  { %487 = vrot.lane.b32.xlu0 %v476_v49, %s865_s8 }
  0xe7   :  { %485 = vrot.lane.b32.xlu2 %v475_v53, %s865_s8  ;;  %483 = vrot.lane.b32.xlu1 %v474_v54, %s865_s8 }
  0xeb   :  { %434 = vrot.lane.b32.xlu0 %v422_v56, %s864_s7 }
  0xee   :  { %v159_v21 = vpop.permute.xlu2 %158 }
  0xef   :  { %432 = vrot.lane.b32.xlu2 %v421_v50, %s864_s7  ;;  %430 = vrot.lane.b32.xlu1 %v420_v51, %s864_s7 }
  0xf3   :  { %544 = vrot.lane.b32.xlu0 %v533_v63, %s866_s9 }
  0xf7   :  { %542 = vrot.lane.b32.xlu2 %v532_v0, %s866_s9  ;;  %540 = vrot.lane.b32.xlu1 %v531_v1, %s866_s9 }
  0xf9   :  { %v220_v2 = vpop.permute.xlu2 %219 }
  0xfb   :  { %481 = vrot.lane.b32.xlu0 %v469_v62, %s865_s8 }
  0xff   :  { %479 = vrot.lane.b32.xlu2 %v468_v59, %s865_s8  ;;  %477 = vrot.lane.b32.xlu1 %v467_v60, %s865_s8 }
 0x101   :  { %v278_v3 = vpop.permute.xlu2 %277 }
 0x103   :  { %538 = vrot.lane.b32.xlu0 %v526_v4, %s866_s9 }
 0x105   :  { %v161_v5 = vpop.permute.xlu0 %160 }
 0x106   :  { %v166_v8 = vsel %vm162_vm0, %v159_v21, %v161_v5 }
 0x107   :  { %536 = vrot.lane.b32.xlu2 %v525_v6, %s866_s9  ;;  %534 = vrot.lane.b32.xlu1 %v524_v7, %s866_s9  ;;  %174 = vst [vmem:[#allocation3 + $0x58] sm:$0xf0] %v166_v8  ;;  %v157_v9 = vpop.permute.xlu1 %156 }
 0x108   :  { %v165_v10 = vsel %vm162_vm0, %v157_v9, %v159_v21 }
 0x109   :  { %173 = vst [vmem:[#allocation3 + $0x70] sm:$0xf0] %v165_v10  ;;  %v214_v11 = vpop.permute.xlu2 %213 }
 0x10b   :  { %154 = vrot.lane.b32.xlu0 %v929_v58, %s859_s0 }
 0x10d   :  { %v222_v12 = vpop.permute.xlu0 %221 }
 0x10e   :  { %v227_v13 = vsel %vm223_vm1, %v220_v2, %v222_v12 }
 0x10f   :  { %152 = vrot.lane.b32.xlu2 %v920_v40, %s859_s0  ;;  %150 = vrot.lane.b32.xlu1 %v918_v39, %s859_s0  ;;  %235 = vst [vmem:[#allocation3 + $0x40] sm:$0xf] %v227_v13 }
 0x111   :  { %v218_v14 = vpop.permute.xlu1 %217  ;;  %v324_v15 = vpop.permute.xlu2 %323 }
 0x112   :  { %v226_v16 = vsel %vm223_vm1, %v218_v14, %v220_v2 }
 0x113   :  { %234 = vst [vmem:[#allocation3 + $0x88] sm:$0xf] %v226_v16 }
 0x115   :  { %v280_v17 = vpop.permute.xlu0 %279 }
 0x116   :  { %v285_v58 = vsel %vm281_vm2, %v278_v3, %v280_v17 }
 0x117   :  { %293 = vst [vmem:[#allocation3 + $0x40] sm:$0xf0] %v285_v58  ;;  %v559_v58 = vld [vmem:[#allocation4] sm:$0xff] }
 0x119   :  { %v276_v18 = vpop.permute.xlu1 %275  ;;  %v272_v19 = vpop.permute.xlu2 %271 }
 0x11a   :  { %v284_v20 = vsel %vm281_vm2, %v276_v18, %v278_v3 }
 0x11b   :  { %292 = vst [vmem:[#allocation3 + $0x88] sm:$0xf0] %v284_v20  ;;  %v622_v20 = vld [vmem:[#allocation3 + $0x58] sm:$0xff] }
 0x11d   :  { %v216_v40 = vpop.permute.xlu0 %215 }
 0x11e   :  { %v225_v22 = vsel %vm223_vm1, %v214_v11, %v216_v40  ;;  %v624_v16 = vld [vmem:[#allocation3 + $0x40] sm:$0xff] }
 0x11f   :  { %233 = vst [vmem:[#allocation3 + $0x38] sm:$0xf] %v225_v22 }
 0x121   :  { %v212_v39 = vpop.permute.xlu1 %211  ;;  %v382_v24 = vpop.permute.xlu2 %381 }
 0x122   :  { %v224_v23 = vsel %vm223_vm1, %v212_v39, %v214_v11  ;;  %v623_v40 = vld [vmem:[#allocation3 + $0x88] sm:$0xff] }
 0x123   :  { %232 = vst [vmem:[#allocation3 + $0x60] sm:$0xf] %v224_v23  ;;  %v621_v23 = vld [vmem:[#allocation3 + $0x70] sm:$0xff] }
 0x125   :  { %v326_v25 = vpop.permute.xlu0 %325 }
 0x126   :  { %v331_v27 = vsel %vm327_vm4, %v324_v15, %v326_v25 }
 0x127   :  { %339 = vst [vmem:[#allocation3 + $0x20] sm:$0xf] %v331_v27 }
 0x129   :  { %v322_v28 = vpop.permute.xlu1 %321  ;;  %v318_v30 = vpop.permute.xlu2 %317 }
 0x12a   :  { %v330_v29 = vsel %vm327_vm4, %v322_v28, %v324_v15 }
 0x12b   :  { %338 = vst [vmem:[#allocation3 + $0x18] sm:$0xf] %v330_v29 }
 0x12d   :  { %v274_v31 = vpop.permute.xlu0 %273 }
 0x12e   :  { %v283_v32 = vsel %vm281_vm2, %v272_v19, %v274_v31 }
 0x12f   :  { %291 = vst [vmem:[#allocation3 + $0x38] sm:$0xf0] %v283_v32 }
 0x131   :  { %v270_v33 = vpop.permute.xlu1 %269  ;;  %v439_v37 = vpop.permute.xlu2 %438 }
 0x132   :  { %v282_v34 = vsel %vm281_vm2, %v270_v33, %v272_v19 }
 0x133   :  { %290 = vst [vmem:[#allocation3 + $0x60] sm:$0xf0] %v282_v34 }
 0x135   :  { %v384_v35 = vpop.permute.xlu0 %383 }
 0x136   :  { %v389_v36 = vsel %vm385_vm5, %v382_v24, %v384_v35  ;;  %v563_v35 = vld [vmem:[#allocation3 + $0x38] sm:$0xff] }
 0x137   :  { %397 = vst [vmem:[#allocation3 + $0x20] sm:$0xf0] %v389_v36 }
 0x139   :  { %v380_v38 = vpop.permute.xlu1 %379  ;;  %v376_v44 = vpop.permute.xlu2 %375 }
 0x13a   :  { %v388_v41 = vsel %vm385_vm5, %v380_v38, %v382_v24  ;;  %v562_v38 = vld [vmem:[#allocation3 + $0x60] sm:$0xff] }
 0x13b   :  { %396 = vst [vmem:[#allocation3 + $0x18] sm:$0xf0] %v388_v41 }
 0x13d   :  { %v320_v42 = vpop.permute.xlu0 %319 }
 0x13e   :  { %v329_v43 = vsel %vm327_vm4, %v318_v30, %v320_v42  ;;  %v626_v13 = vld [vmem:[#allocation3 + $0x20] sm:$0xff] }
 0x13f   :  { %337 = vst [vmem:[#allocation3 + $0x48] sm:$0xf] %v329_v43 }
 0x141   :  { %v316_v45 = vpop.permute.xlu1 %315  ;;  %v486_v51 = vpop.permute.xlu2 %485 }
 0x142   :  { %v328_v46 = vsel %vm327_vm4, %v316_v45, %v318_v30  ;;  %v625_v18 = vld [vmem:[#allocation3 + $0x18] sm:$0xff] }
 0x143   :  { %336 = vst [vmem:[#allocation3 + $0x8] sm:$0xf] %v328_v46 }
 0x145   :  { %v441_v47 = vpop.permute.xlu0 %440 }
 0x146   :  { %v446_v48 = vsel %vm442_vm6, %v439_v37, %v441_v47 }
 0x147   :  { %454 = vst [vmem:[#allocation3 + $0x30] sm:$0xf] %v446_v48 }
 0x149   :  { %v437_v49 = vpop.permute.xlu1 %436  ;;  %v433_v56 = vpop.permute.xlu2 %432 }
 0x14a   :  { %v445_v50 = vsel %vm442_vm6, %v437_v49, %v439_v37 }
 0x14b   :  { %453 = vst [vmem:[#allocation3 + $0x98] sm:$0xf] %v445_v50 }
 0x14d   :  { %v378_v52 = vpop.permute.xlu0 %377 }
 0x14e   :  { %v387_v53 = vsel %vm385_vm5, %v376_v44, %v378_v52 }
 0x14f   :  { %395 = vst [vmem:[#allocation3 + $0x48] sm:$0xf0] %v387_v53 }
 0x151   :  { %v374_v54 = vpop.permute.xlu1 %373  ;;  %v543_v21 = vpop.permute.xlu2 %542 }
 0x152   :  { %v386_v55 = vsel %vm385_vm5, %v374_v54, %v376_v44 }
 0x153   :  { %394 = vst [vmem:[#allocation3 + $0x8] sm:$0xf0] %v386_v55  ;;  %v867_v55 = vmov 0  }
 0x154   :  { %794 = vset.pattern.permute.xlu1 %v867_v55  ;;  %795 = vset.pattern.permute.xlu2 %v867_v55 }
 0x155   :  { %v488_v57 = vpop.permute.xlu0 %487  ;;  %796 = vset.pattern.permute.xlu0 %v867_v55 }
 0x156   :  { %v493_v59 = vsel %vm489_vm7, %v486_v51, %v488_v57  ;;  %v565_v33 = vld [vmem:[#allocation3 + $0x48] sm:$0xff] }
 0x157   :  { %501 = vst [vmem:[#allocation3 + $0x30] sm:$0xf0] %v493_v59 }
 0x159   :  { %v484_v60 = vpop.permute.xlu1 %483  ;;  %v480_v3 = vpop.permute.xlu2 %479 }
 0x15a   :  { %v492_v26 = vsel %vm489_vm7, %v484_v60, %v486_v51  ;;  %v564_v36 = vld [vmem:[#allocation3 + $0x8] sm:$0xff] }
 0x15b   :  { %500 = vst [vmem:[#allocation3 + $0x98] sm:$0xf0] %v492_v26 }
 0x15d   :  { %v435_v61 = vpop.permute.xlu0 %434 }
 0x15e   :  { %v444_v62 = vsel %vm442_vm6, %v433_v56, %v435_v61  ;;  %v628_v9 = vld [vmem:[#allocation3 + $0x30] sm:$0xff] }
 0x15f   :  { %452 = vst [vmem:[#allocation3 + $0x50] sm:$0xf] %v444_v62 }
 0x161   :  { %v431_v63 = vpop.permute.xlu1 %430  ;;  %v537_v14 = vpop.permute.xlu2 %536 }
 0x162   :  { %v443_v0 = vsel %vm442_vm6, %v431_v63, %v433_v56  ;;  %v627_v15 = vld [vmem:[#allocation3 + $0x98] sm:$0xff] }
 0x163   :  { %451 = vst [vmem:[#allocation3 + $0x78] sm:$0xf] %v443_v0 }
 0x165   :  { %v545_v1 = vpop.permute.xlu0 %544 }
 0x166   :  { %v550_v2 = vsel %vm546_vm8, %v543_v21, %v545_v1 }
 0x167   :  { %558 = vst [vmem:[#allocation3 + $0x90] sm:$0xf] %v550_v2 }
 0x169   :  { %v541_v4 = vpop.permute.xlu1 %540  ;;  %v153_v24 = vpop.permute.xlu2 %152 }
 0x16a   :  { %v549_v5 = vsel %vm546_vm8, %v541_v4, %v543_v21 }
 0x16b   :  { %557 = vst [vmem:[#allocation3 + $0x80] sm:$0xf] %v549_v5 }
 0x16d   :  { %v482_v6 = vpop.permute.xlu0 %481 }
 0x16e   :  { %v491_v7 = vsel %vm489_vm7, %v480_v3, %v482_v6  ;;  %v630_v8 = vld [vmem:[#allocation3 + $0x90] sm:$0xf]  ;;  %v701_v6 = vld [vmem:[%s1023_s2] sm:$0xff]  ;;  %s868_s2 = smov [#allocation7]  }
 0x16f   :  { %499 = vst [vmem:[#allocation3 + $0x50] sm:$0xf0] %v491_v7  ;;  %773 = vmatpush.msk.msra.mxu3 %vm106_vm3, %v630_v8  ;;  %s748_s14 = sshll.u32 %s868_s2, 4  ;;  %s749_s14 = int_to_ptr.vmem [resolvable:$true] %s748_s14 }
 0x171   :  { %v478_v10 = vpop.permute.xlu1 %477  ;;  %669 = vmatpush.msra.mxu3 %v628_v9 }
 0x172   :  { %v490_v11 = vsel %vm489_vm7, %v478_v10, %v480_v3  ;;  %v629_v12 = vld [vmem:[#allocation3 + $0x80] sm:$0xf] }
 0x173   :  { %498 = vst [vmem:[#allocation3 + $0x78] sm:$0xf0] %v490_v11  ;;  %771 = vmatpush.msk.msra.mxu2 %vm106_vm3, %v629_v12  ;;  %670 = vmatpush.msra.mxu3 %v626_v13  ;;  %v714_v10 = vld [vmem:[%s1024_s3] sm:$0xff] }
 0x175   :  { %649 = vmatpush.msra.mxu2 %v627_v15  ;;  %v539_v17 = vpop.permute.xlu0 %538  ;;  %671 = vmatpush.msra.mxu3 %v624_v16 }
 0x176   :  { %v548_v19 = vsel %vm546_vm8, %v537_v14, %v539_v17  ;;  %v567_v29 = vld [vmem:[#allocation3 + $0x50] sm:$0xff] }
 0x177   :  { %650 = vmatpush.msra.mxu2 %v625_v18  ;;  %556 = vst [vmem:[#allocation3 + $0x28] sm:$0xf] %v548_v19  ;;  %672 = vmatpush.msra.mxu3 %v622_v20 }
 0x178   :  { %774 = vmatmul.msk.f32.vlgmr.msra.gmra.mxu3 %vm570_vm9, %v559_v58 }
 0x179   :  { %651 = vmatpush.msra.mxu2 %v623_v40  ;;  %v535_v22 = vpop.permute.xlu1 %534 }
 0x17a   :  { %v547_v39 = vsel %vm546_vm8, %v535_v22, %v537_v14  ;;  %v566_v34 = vld [vmem:[#allocation3 + $0x78] sm:$0xff] }
 0x17b   :  { %555 = vst [vmem:[#allocation3 + $0x10] sm:$0xf] %v547_v39  ;;  %652 = vmatpush.msra.mxu2 %v621_v23 }
 0x17c   :  { %772 = vmatmul.msk.f32.vlgmr.msra.gmra.mxu2 %vm570_vm9, %v559_v58 }
 0x17d   :  { %v155_v25 = vpop.permute.xlu0 %154 }
 0x17e   :  { %v164_v27 = vsel %vm162_vm0, %v153_v24, %v155_v25  ;;  %v569_v28 = vld [vmem:[#allocation3 + $0x28] sm:$0xf] }
 0x17f   :  { %172 = vst [vmem:[#allocation3 + $0x68] sm:$0xf0] %v164_v27  ;;  %769 = vmatpush.msk.msra.mxu1 %vm106_vm3, %v569_v28 }
 0x181   :  { %v151_v30 = vpop.permute.xlu1 %150  ;;  %612 = vmatpush.msra.mxu1 %v567_v29 }
 0x182   :  { %v163_v31 = vsel %vm162_vm0, %v151_v30, %v153_v24  ;;  %v568_v32 = vld [vmem:[#allocation3 + $0x10] sm:$0xf] }
 0x183   :  { %171 = vst [vmem:[#allocation3] sm:$0xf0] %v163_v31  ;;  %767 = vmatpush.msk.msra.mxu0 %vm106_vm3, %v568_v32  ;;  %613 = vmatpush.msra.mxu1 %v565_v33 }
 0x185   :  { %592 = vmatpush.msra.mxu0 %v566_v34  ;;  %614 = vmatpush.msra.mxu1 %v563_v35 }
 0x186   :  { %v561_v37 = vld [vmem:[#allocation3 + $0x68] sm:$0xff] }
 0x187   :  { %593 = vmatpush.msra.mxu0 %v564_v36  ;;  %615 = vmatpush.msra.mxu1 %v561_v37 }
 0x188   :  { %770 = vmatmul.msk.f32.vlgmr.msra.gmra.mxu1 %vm570_vm9, %v559_v58 }
 0x189   :  { %594 = vmatpush.msra.mxu0 %v562_v38 }
 0x18a   :  { %v560_v41 = vld [vmem:[#allocation3] sm:$0xff] }
 0x18b   :  { %595 = vmatpush.msra.mxu0 %v560_v41 }
 0x18c   :  { %768 = vmatmul.msk.f32.vlgmr.msra.gmra.mxu0 %vm570_vm9, %v559_v58 }
 0x1fb   :  { %v674_v42 = vpop.f32.mrf.mxu3 }
 0x1fc   :  { %v692_v46 = vmul.f32 %v674_v42, %v674_v42 }
 0x1ff   :  { %v654_v43 = vpop.f32.mrf.mxu2 }
 0x200   :  { %v681_v44 = vadd.f32 %v674_v42, %v654_v43  ;;  %v691_v45 = vmul.f32 %v654_v43, %v654_v43 }
 0x202   :  { %682 = vadd.xlane.f32.xlu2 %v681_v44  ;;  %v693_v49 = vadd.f32 %v692_v46, %v691_v45 }
 0x205   :  { %v617_v47 = vpop.f32.mrf.mxu1 }
 0x206   :  { %v686_v48 = vmul.f32 %v617_v47, %v617_v47 }
 0x209   :  { %v597_v50 = vpop.f32.mrf.mxu0 }
 0x20a   :  { %v685_v51 = vmul.f32 %v597_v50, %v597_v50  ;;  %694 = vadd.xlane.f32.xlu2 %v693_v49  ;;  %v677_v52 = vadd.f32 %v617_v47, %v597_v50 }
 0x20c   :  { %678 = vadd.xlane.f32.xlu1 %v677_v52  ;;  %v687_v53 = vadd.f32 %v686_v48, %v685_v51 }
 0x20e   :  { %688 = vadd.xlane.f32.xlu0 %v687_v53 }
 0x275   :  { %v683_v54 = vpop.xlane.xlu2 %682 }
 0x27d   :  { %v695_v59 = vpop.xlane.xlu2 %694 }
 0x27f   :  { %v679_v56 = vpop.xlane.xlu1 %678 }
 0x280   :  { %v684_v57 = vadd.f32 %v683_v54, %v679_v56 }
 0x281   :  { %v689_v60 = vpop.xlane.xlu0 %688 }
 0x282   :  { %v697_v26 = vmul.f32 0.001953125, %v684_v57  ;;  %v696_v61 = vadd.f32 %v695_v59, %v689_v60 }
 0x284   :  { %v699_v62 = vmul.f32 %v697_v26, %v697_v26  ;;  %v698_v21 = vmul.f32 0.001953125, %v696_v61 }
 0x286   :  { %v700_v63 = vsub.f32 %v698_v21, %v699_v62 }
 0x288   :  { %v702_v0 = vadd.f32 1e-05, %v700_v63 }
 0x28a   :  { %797 = vrsqrt.f32 %v702_v0  ;;  %vm709_vm10 = vweird.f32 %v702_v0 }
 0x290   :  { %v798_v1 = vpop.eup %797 }
 0x291   :  { %v704_v2 = vmul.f32 %v798_v1, %v702_v0  ;;  %vm710_vm3 = vweird.f32 %v798_v1 }
 0x292   :  { %vm711_vm11 = vmor %vm709_vm10, %vm710_vm3 }
 0x293   :  { %v705_v3 = vmul.f32 %v798_v1, %v704_v2 }
 0x295   :  { %v706_v4 = vmul.f32 0.5, %v705_v3 }
 0x297   :  { %v707_v5 = vsub.f32 1.5, %v706_v4 }
 0x299   :  { %v708_v7 = vmul.f32 %v798_v1, %v707_v5 }
 0x29b   :  { %v712_v8 = vsel %vm711_vm11, %v798_v1, %v708_v7 }
 0x29c   :  { %v713_v9 = vmul.f32 %v712_v8, %v701_v6 }
 0x29e   :  { %719 = vperm.xlu1 %794, %v713_v9   ;;  %v715_v11 = vmul.f32 %v713_v9, %v697_v26 }
 0x2a0   :  { %v716_v12 = vsub.f32 %v714_v10, %v715_v11 }
 0x2a2   :  { %726 = vperm.xlu2 %795, %v716_v12  }
 0x2fc   :  { %v727_v58 = vpop.permute.xlu2 %726 }
 0x310   :  { %v720_v13 = vpop.permute.xlu1 %719 }
 0x311   :  { %v722_v14 = vmul.f32 %v720_v13, %v597_v50  ;;  %v723_v15 = vmul.f32 %v720_v13, %v617_v47  ;;  %v735_v16 = vmul.f32 %v720_v13, %v654_v43  ;;  %v736_v17 = vmul.f32 %v720_v13, %v674_v42 }
 0x313   :  { %v729_v18 = vadd.f32 %v727_v58, %v722_v14  ;;  %v730_v19 = vadd.f32 %v727_v58, %v723_v15  ;;  %v737_v20 = vadd.f32 %v735_v16, %v727_v58  ;;  %v738_v40 = vadd.f32 %v736_v17, %v727_v58 }
 0x315   :  { %v731_v22 = vmax.f32 %v729_v18, 0.0  ;;  %v732_v39 = vmax.f32 %v730_v19, 0.0  ;;  %v739_v23 = vmax.f32 %v737_v20, 0.0  ;;  %v740_v24 = vmax.f32 %v738_v40, 0.0 }
 0x317   :  { %733 = vst [vmem:[#allocation7] sm:$0xff] %v731_v22 }
 0x318   :  { %734 = vst [vmem:[#allocation7 + $0x8] sm:$0xff] %v732_v39 }
 0x319   :  { %742 = vst [vmem:[#allocation7 + $0x10] sm:$0xff] %v739_v23 }
 0x31a   :  { %743 = vst [vmem:[#allocation7 + $0x18] sm:$0xff] %v740_v24 }
 0x31b   :  { %756 = dma.vmem_to_hbm [thread:$0]  %s749_s14, 512, %s751_s16, [#allocation6], %s869_s17, %s869_s17, %s856_s26  }
 0x31c   :  { %849 = dma.done.wait [#allocation6], 512  }
 0x31d   :  { %850 = vsyncadd [#allocation6], 4294966784 }
 0x31e   :  { %761 = vsyncpa [#allocation5], 1 }
 0x31f   :  { %762 = vsyncpa [#allocation6], 1 }

</bundles_post_ra>
